<compile_context>
chip_gen: v5e
topology: v5e:2x2
jax: 0.10.0
libtpu: 0.0.40
codegen_flags: <defaults>
</compile_context>

<pallas_src>
import functools
import math

import jax
import jax.numpy as jnp
from jax import lax
from jax.experimental import pallas as pl
from jax.experimental.pallas import tpu as pltpu


# ----------------------------------------------------------------------------- #
# Stateless hash RNG (murmur3 fmix32) -- pure VPU integer ops                    #
# ----------------------------------------------------------------------------- #
def _fmix32(x):
    x = x ^ (x >> 16)
    x = x * jnp.uint32(0x85EBCA6B)
    x = x ^ (x >> 13)
    x = x * jnp.uint32(0xC2B2AE35)
    x = x ^ (x >> 16)
    return x


# ----------------------------------------------------------------------------- #
# Pallas kernel: out_tile = dropout(x_tile + pe_tile)                            #
# ----------------------------------------------------------------------------- #
def _pe_add_dropout_kernel(seed_ref, x_ref, pe_ref, o_ref, *, p, training, block_s):
    # x_ref : (tS, B, D) VMEM
    # pe_ref: (tS, D)    VMEM  -> broadcast over batch inside the kernel
    # seed_ref: (1,) int32 SMEM
    x = x_ref[...].astype(jnp.float32)          # f32 compute (safe on v5e too)
    pe = pe_ref[...].astype(jnp.float32)
    y = x + pe[:, None, :]

    if training and p > 0.0:
        tS, B, D = x_ref.shape
        shape = (tS, B, D)
        # Global element index -> tiling-invariant, per-tile-distinct randoms.
        ri = lax.broadcasted_iota(jnp.int32, shape, 0).astype(jnp.uint32)
        bi = lax.broadcasted_iota(jnp.int32, shape, 1).astype(jnp.uint32)
        di = lax.broadcasted_iota(jnp.int32, shape, 2).astype(jnp.uint32)
        row0 = (pl.program_id(0) * block_s).astype(jnp.uint32)
        idx = (row0 + ri) * jnp.uint32(B * D) + bi * jnp.uint32(D) + di
        seed_u = seed_ref[0].astype(jnp.uint32)
        z = _fmix32(idx + seed_u * jnp.uint32(0x9E3779B9))
        # Integer keep-threshold: avoids shift->f32-cast->mul->float-cmp chain.
        thr = jnp.uint32(min(int(round(p * (2.0 ** 32))), (1 << 32) - 1))
        keep = z >= thr                                   # P(keep) = 1 - p
        y = jnp.where(keep, y * (1.0 / (1.0 - p)), jnp.zeros_like(y))

    o_ref[...] = y.astype(o_ref.dtype)


# ----------------------------------------------------------------------------- #
# Module-equivalent wrapper                                                      #
# ----------------------------------------------------------------------------- #
def make_pe_table(d_model, max_len=5000, dtype=jnp.float32):
    """Same values as the PyTorch buffer, but kept 2-D: (max_len, d_model)."""
    position = jnp.arange(0, max_len, dtype=jnp.float32)[:, None]            # (L, 1)
    div_term = jnp.exp(jnp.arange(0, d_model, 2, dtype=jnp.float32)
                       * (-math.log(10000.0) / d_model))                     # (D/2,)
    angles = position * div_term                                             # (L, D/2)
    pe = jnp.zeros((max_len, d_model), dtype=jnp.float32)
    pe = pe.at[:, 0::2].set(jnp.sin(angles))
    pe = pe.at[:, 1::2].set(jnp.cos(angles))
    return pe.astype(dtype)


def _choose_block_s(S, B, D, itemsize, target_bytes=2 << 20):
    """Sequence-tile rows sized for ~2 MiB per x-tile: fits default scoped VMEM
    (16 MiB v5e / 32 MiB v6e & v7x) with double-buffered x/pe/out."""
    per_row = max(1, B * D * itemsize)
    ts = max(1, int(target_bytes // per_row))
    ts = min(ts, S)
    if S >= 8:
        ts = max(8, (ts // 8) * 8)   # keep pe's sublane dim 8-aligned
    return ts


def positional_encoding_forward(x, pe, *, p=0.1, training=False, seed=0):
    """x: (S, B, D). pe: (max_len, D). Returns dropout(x + pe[:S]) like the module."""
    S, B, D = x.shape
    assert pe.ndim == 2 and pe.shape[1] == D and pe.shape[0] >= S

    tS = _choose_block_s(S, B, D, jnp.dtype(x.dtype).itemsize)
    grid = (pl.cdiv(S, tS),)

    # Normally pass the FULL pe table and let the BlockSpec index_map pick the
    # row-block (no materialized pe[:S] slice). Only for tiny S (< 8, tS == S)
    # slice so the pe block equals the full array dims (layout rule).
    pe_in = pe if (tS % 8 == 0) else pe[:S]

    seed_arr = jnp.asarray([seed], dtype=jnp.int32)
    kernel = functools.partial(
        _pe_add_dropout_kernel, p=float(p), training=bool(training), block_s=tS)

    return pl.pallas_call(
        kernel,
        out_shape=jax.ShapeDtypeStruct((S, B, D), x.dtype),
        grid=grid,
        in_specs=[
            pl.BlockSpec(memory_space=pltpu.MemorySpace.SMEM),        # seed scalar
            pl.BlockSpec((tS, B, D), lambda i: (i, 0, 0)),            # x tile
            pl.BlockSpec((tS, D), lambda i: (i, 0)),                  # pe row-block
        ],
        out_specs=pl.BlockSpec((tS, B, D), lambda i: (i, 0, 0)),
        compiler_params=pltpu.CompilerParams(
            dimension_semantics=("parallel",),   # shard S-tiles across TCs (v7x)
        ),
    )(seed_arr, x, pe_in)


# ----------------------------------------------------------------------------- #
# Demo / self-check                                                              #
# ----------------------------------------------------------------------------- #
if __name__ == "__main__":
    seq_len, batch, d_model = 8, 2, 32
    max_len = 5000
    dropout_p = 0.1

    key = jax.random.PRNGKey(0)
    x = jax.random.normal(key, (seq_len, batch, d_model), dtype=jnp.float32)

    pe = make_pe_table(d_model, max_len=max_len)

    # Eval mode (dropout == identity): must match x + pe[:S] exactly.
    out_eval = positional_encoding_forward(x, pe, p=dropout_p, training=False)
    out_eval = jax.block_until_ready(out_eval)
    ref = x + pe[:seq_len][:, None, :]
    assert out_eval.shape == (seq_len, batch, d_model)
    assert float(jnp.max(jnp.abs(out_eval - ref))) < 1e-5

    # Training mode: exercise the in-kernel stochastic dropout path.
    # (Stochastic; RNG stream differs from torch, semantics match nn.Dropout.)
    out_train = positional_encoding_forward(
        x, pe, p=dropout_p, training=True, seed=1234)
    out_train = jax.block_until_ready(out_train)
    assert out_train.shape == (seq_len, batch, d_model)
    nonzero = out_train != 0.0
    assert bool(jnp.allclose(
        jnp.where(nonzero, out_train, 0.0),
        jnp.where(nonzero, ref / (1.0 - dropout_p), 0.0),
        atol=1e-5,
    ))

    print("KERNEL_OK")
</pallas_src>

<mosaic_0001>
module attributes {stable_mosaic.version = 11 : i64} {
  func.func @_pe_add_dropout_kernel(%arg0: i32, %arg1: memref<1xi32, #tpu.memory_space<smem>>, %arg2: memref<8x2x32xf32, #tpu.memory_space<vmem>>, %arg3: memref<8x32xf32, #tpu.memory_space<vmem>>, %arg4: memref<8x2x32xf32, #tpu.memory_space<vmem>>) attributes {dimension_semantics = [#tpu.dimension_semantics<parallel>], iteration_bounds = array<i64: 1>, scalar_prefetch = 0 : i64, scratch_operands = 0 : i64, tpu.core_type = #tpu.core_type<tc>, window_params = [{transform_indices = @transform_0, window_bounds = array<i64: 1>}, {transform_indices = @transform_1, window_bounds = array<i64: 8, 2, 32>}, {transform_indices = @transform_2, window_bounds = array<i64: 8, 32>}, {transform_indices = @transform_3, window_bounds = array<i64: 8, 2, 32>}]} {
    %c0 = arith.constant 0 : index
    %c0_0 = arith.constant 0 : index
    %c0_1 = arith.constant 0 : index
    %0 = vector.load %arg2[%c0, %c0_0, %c0_1] : memref<8x2x32xf32, #tpu.memory_space<vmem>>, vector<8x2x32xf32>
    %c0_2 = arith.constant 0 : index
    %c0_3 = arith.constant 0 : index
    %1 = vector.load %arg3[%c0_2, %c0_3] : memref<8x32xf32, #tpu.memory_space<vmem>>, vector<8x32xf32>
    %2 = vector.shape_cast %1 : vector<8x32xf32> to vector<8x1x32xf32>
    %3 = vector.broadcast %2 : vector<8x1x32xf32> to vector<8x2x32xf32>
    %4 = arith.addf %0, %3 : vector<8x2x32xf32>
    %c0_4 = arith.constant 0 : index
    %c0_5 = arith.constant 0 : index
    %c0_6 = arith.constant 0 : index
    %5 = vector.load %arg4[%c0_4, %c0_5, %c0_6] : memref<8x2x32xf32, #tpu.memory_space<vmem>>, vector<8x2x32xf32>
    tpu.vector_store %arg4[%c0_4, %c0_5, %c0_6], %4 {strides = array<i32>} : memref<8x2x32xf32, #tpu.memory_space<vmem>>, vector<8x2x32xf32>,
    return
  }
  func.func @transform_0(%arg0: i32) -> i32 {
    %c0_i32 = arith.constant 0 : i32
    %c0_i32_0 = arith.constant 0 : i32
    return %c0_i32 : i32
  }
  func.func @transform_1(%arg0: i32) -> (i32, i32, i32) {
    %c0_i32 = arith.constant 0 : i32
    %c0_i32_0 = arith.constant 0 : i32
    %c0_i32_1 = arith.constant 0 : i32
    return %arg0, %c0_i32, %c0_i32_0 : i32, i32, i32
  }
  func.func @transform_2(%arg0: i32) -> (i32, i32) {
    %c0_i32 = arith.constant 0 : i32
    %c0_i32_0 = arith.constant 0 : i32
    return %arg0, %c0_i32 : i32, i32
  }
  func.func @transform_3(%arg0: i32) -> (i32, i32, i32) {
    %c0_i32 = arith.constant 0 : i32
    %c0_i32_0 = arith.constant 0 : i32
    %c0_i32_1 = arith.constant 0 : i32
    return %arg0, %c0_i32, %c0_i32_0 : i32, i32, i32
  }
}

</mosaic_0001>

<bundles_post_ra>
// kernel: tpu_custom_call.1
= control target key start
LH: loop header
LB: loop body
LE: loop exit
PB: predicated region body
PF: predicated region fallthrough
CT: control target
= control target key end

     0   :  { %vm57_vm0 = vcmask 254976   ;;  %s174_s0 = inlined_call_operand.<no memory space> [shape: s32[1], index: 0, kind: input, shape index: {}]   ;;  %s175_s1 = inlined_call_operand.vmem [shape: f32[8,2,32], index: 1, kind: input, shape index: {}]   ;;  %s176_s2 = inlined_call_operand.vmem [shape: f32[5000,32], index: 2, kind: input, shape index: {}]   ;;  %s177_s3 = inlined_call_operand.hbm [shape: f32[8,2,32], index: 3, kind: output, shape index: {}]  }
   0x1   :  { %v16_v0 = vld [vmem:[%s175_s1] sm:$0x3]  ;;  %v17_v2 = vld [vmem:[%s175_s1 + $0x2] sm:$0x3]  ;;  %v18_v5 = vld [vmem:[%s175_s1 + $0x4] sm:$0x3] }
   0x2   :  { %v24_v1 = vld [vmem:[%s176_s2] sm:$0xff]  ;;  %v20_v9 = vld [vmem:[%s175_s1 + $0x8] sm:$0x3]  ;;  %v21_v16 = vld [vmem:[%s175_s1 + $0xa] sm:$0x3] }
   0x3   :  { %v33_v3 = vperm.slane %v24_v1, 0  ;;  %v26_v4 = vrot.slane %v24_v1, 1  ;;  %v27_v6 = vrot.slane %v24_v1, 2  ;;  %v28_v7 = vrot.slane %v24_v1, 3  ;;  %v19_v8 = vld [vmem:[%s175_s1 + $0x6] sm:$0x3] }
   0x4   :  { %v29_v10 = vrot.slane %v24_v1, 4  ;;  %v30_v11 = vrot.slane %v24_v1, 5  ;;  %v31_v19 = vrot.slane %v24_v1, 6  ;;  %v32_v20 = vrot.slane %v24_v1, 7  ;;  %v22_v24 = vld [vmem:[%s175_s1 + $0xc] sm:$0x3] }
   0x5   :  { %v49_v12 = vadd.f32 %v33_v3, %v16_v0  ;;  %v34_v13 = vperm.slane %v26_v4, 0  ;;  %v35_v14 = vperm.slane %v27_v6, 0  ;;  %v36_v15 = vperm.slane %v28_v7, 0 }
   0x6   :  { %v37_v17 = vperm.slane %v29_v10, 0  ;;  %v38_v18 = vperm.slane %v30_v11, 0 }
   0x7   :  { %58 = vst.msk [vmem:[#allocation3] sm:$0x3] %vm57_vm0, %v49_v12  ;;  %v50_v21 = vadd.f32 %v34_v13, %v17_v2  ;;  %v51_v22 = vadd.f32 %v35_v14, %v18_v5  ;;  %v52_v23 = vadd.f32 %v36_v15, %v19_v8 }
   0x8   :  { %9 = vsyncpa [#allocation4], 0  ;;  %v53_v25 = vadd.f32 %v37_v17, %v20_v9  ;;  %v39_v26 = vperm.slane %v31_v19, 0  ;;  %v23_v27 = vld [vmem:[%s175_s1 + $0xe] sm:$0x3]  ;;  %v40_v28 = vperm.slane %v32_v20, 0  ;;  %v54_v29 = vadd.f32 %v38_v18, %v21_v16 }
   0x9   :  { %59 = vst.msk [vmem:[#allocation3 + $0x2] sm:$0x3] %vm57_vm0, %v50_v21  ;;  %s113_s28 = smov [#allocation3]   ;;  %s72_s5 = sshll.u32 %s177_s3, 4  ;;  %s73_s5 = int_to_ptr.hbm [resolvable:$true] %s72_s5 }
   0xa   :  { %s70_s29 = sshll.u32 %s113_s28, 4  ;;  %60 = vst.msk [vmem:[#allocation3 + $0x4] sm:$0x3] %vm57_vm0, %v51_v22  ;;  %v55_v30 = vadd.f32 %v39_v26, %v22_v24  ;;  %v56_v31 = vadd.f32 %v40_v28, %v23_v27  ;;  %s114_s1 = smov 32   ;;  %s71_s29 = int_to_ptr.vmem [resolvable:$true] %s70_s29 }
   0xb   :  { %61 = vst.msk [vmem:[#allocation3 + $0x6] sm:$0x3] %vm57_vm0, %v52_v23  ;;  %s115_s6 = smov 2  }
   0xc   :  { %62 = vst.msk [vmem:[#allocation3 + $0x8] sm:$0x3] %vm57_vm0, %v53_v25 }
   0xd   :  { %63 = vst.msk [vmem:[#allocation3 + $0xa] sm:$0x3] %vm57_vm0, %v54_v29 }
   0xe   :  { %64 = vst.msk [vmem:[#allocation3 + $0xc] sm:$0x3] %vm57_vm0, %v55_v30 }
   0xf   :  { %65 = vst.msk [vmem:[#allocation3 + $0xe] sm:$0x3] %vm57_vm0, %v56_v31 }
  0x10   :  { %78 = dma.vmem_to_hbm [thread:$0]  %s71_s29, 256, %s73_s5, [#allocation4], %s114_s1, %s114_s1, %s115_s6  }
  0x11   :  { %111 = dma.done.wait [#allocation4], 256  }
  0x12   :  { %112 = vsyncadd [#allocation4], 4294967040 }
  0x13   :  { %83 = vsyncpa [#allocation4], 1 }

</bundles_post_ra>
